<compile_context>
chip_gen: v6e
topology: v6e:2x2x1
jax: 0.10.0
libtpu: 0.0.40
codegen_flags: <defaults>
</compile_context>

<pallas_src>
import numpy as np
import jax
import jax.numpy as jnp
from jax.experimental import pallas as pl
from jax.experimental.pallas import tpu as pltpu

# ----- module hyper-parameters (small, consistent with the nn.Module) -------
N_DIM    = 16                  # per-head dim
N_HEAD   = 4
D_MODEL  = N_HEAD * N_DIM      # 64  (conv in/out channels)
D_FF     = N_DIM * 2           # 32  (hidden channels)
D_FF_PAD = 128                 # lane-dense padded hidden dim
BATCH    = 2
SEQ      = 8


# ----------------------------- Pallas kernel --------------------------------
def ffn_kernel(x_ref, w1_ref, b1_ref, w2_ref, b2_ref, o_ref):
    x = x_ref[...]                                                    # (M, D)
    h = jnp.dot(x, w1_ref[...], preferred_element_type=jnp.float32) + b1_ref[...]
    h = jnp.maximum(h, 0.0)                                           # (M, D_FF_PAD)
    y = jnp.dot(h, w2_ref[...], preferred_element_type=jnp.float32) + b2_ref[...]
    o_ref[...] = y.astype(o_ref.dtype)                                # (M, D)


def position_wise_ffn(x, padded_params):
    """x: (B, L, D) f32.  padded_params: dict with lane-dense padded weights."""
    B, L, D = x.shape
    assert D == D_MODEL
    M = B * L                                   # fold batch+seq into the row dim
    x2d = x.reshape(M, D)

    w1p, b1p, w2p, b2r = (padded_params["w1p"], padded_params["b1p"],
                          padded_params["w2p"], padded_params["b2r"])

    out2d = pl.pallas_call(
        ffn_kernel,
        out_shape=jax.ShapeDtypeStruct((M, D), jnp.float32),
        grid=(1,),                              # single program: no pipelining needed
        in_specs=[
            pl.BlockSpec((M, D),           lambda i: (0, 0)),
            pl.BlockSpec((D, D_FF_PAD),    lambda i: (0, 0)),
            pl.BlockSpec((1, D_FF_PAD),    lambda i: (0, 0)),
            pl.BlockSpec((D_FF_PAD, D),    lambda i: (0, 0)),
            pl.BlockSpec((1, D),           lambda i: (0, 0)),
        ],
        out_specs=pl.BlockSpec((M, D), lambda i: (0, 0)),
        compiler_params=pltpu.CompilerParams(dimension_semantics=("arbitrary",)),
    )(x2d, w1p, b1p, w2p, b2r)

    return out2d.reshape(B, L, D)


# ----------------------------- parameters -----------------------------------
def init_params(key):
    """Deterministic synthetic params.  Weights stored as (in, out), i.e. the
    transpose of torch's Conv1d weight[:, :, 0]."""
    k1, k2, k3, k4 = jax.random.split(key, 4)
    w1 = jax.random.normal(k1, (D_MODEL, D_FF), jnp.float32) * (1.0 / np.sqrt(D_MODEL))
    b1 = jax.random.normal(k2, (D_FF,), jnp.float32) * 0.01
    w2 = jax.random.normal(k3, (D_FF, D_MODEL), jnp.float32) * (1.0 / np.sqrt(D_FF))
    b2 = jax.random.normal(k4, (D_MODEL,), jnp.float32) * 0.01
    return {"w1": w1, "b1": b1, "w2": w2, "b2": b2}


def prep_padded_params(p):
    """One-time zero-padding of the hidden dim to 128 lanes (result unchanged:
    ReLU(0)=0 and the padded W2 rows are zero)."""
    w1p = jnp.zeros((D_MODEL, D_FF_PAD), jnp.float32).at[:, :D_FF].set(p["w1"])
    b1p = jnp.zeros((1, D_FF_PAD), jnp.float32).at[0, :D_FF].set(p["b1"])
    w2p = jnp.zeros((D_FF_PAD, D_MODEL), jnp.float32).at[:D_FF, :].set(p["w2"])
    b2r = p["b2"].reshape(1, D_MODEL)
    return {"w1p": w1p, "b1p": b1p, "w2p": w2p, "b2r": b2r}


# pure-JAX reference (unpadded weights) for a correctness sanity check
def ffn_ref(x, p):
    h = jnp.maximum(x @ p["w1"] + p["b1"], 0.0)
    return h @ p["w2"] + p["b2"]


if __name__ == "__main__":
    key = jax.random.PRNGKey(0)
    k_x, k_p = jax.random.split(key)

    x = jax.random.normal(k_x, (BATCH, SEQ, D_MODEL), jnp.float32)
    params = init_params(k_p)
    padded = prep_padded_params(params)

    out = position_wise_ffn(x, padded)
    out = jax.block_until_ready(out)

    ref = ffn_ref(x, params)
    np.testing.assert_allclose(np.asarray(out), np.asarray(ref), rtol=1e-4, atol=1e-4)

    print("KERNEL_OK")
</pallas_src>

<mosaic_0001>
module attributes {stable_mosaic.version = 11 : i64} {
  func.func @ffn_kernel(%arg0: i32, %arg1: memref<16x64xf32, #tpu.memory_space<vmem>>, %arg2: memref<64x128xf32, #tpu.memory_space<vmem>>, %arg3: memref<1x128xf32, #tpu.memory_space<vmem>>, %arg4: memref<128x64xf32, #tpu.memory_space<vmem>>, %arg5: memref<1x64xf32, #tpu.memory_space<vmem>>, %arg6: memref<16x64xf32, #tpu.memory_space<vmem>>) attributes {dimension_semantics = [#tpu.dimension_semantics<arbitrary>], iteration_bounds = array<i64: 1>, scalar_prefetch = 0 : i64, scratch_operands = 0 : i64, tpu.core_type = #tpu.core_type<tc>, window_params = [{pipeline_mode = #tpu.pipeline_mode<synchronous>, transform_indices = @transform_0, window_bounds = array<i64: 16, 64>}, {pipeline_mode = #tpu.pipeline_mode<synchronous>, transform_indices = @transform_1, window_bounds = array<i64: 64, 128>}, {pipeline_mode = #tpu.pipeline_mode<synchronous>, transform_indices = @transform_2, window_bounds = array<i64: 1, 128>}, {pipeline_mode = #tpu.pipeline_mode<synchronous>, transform_indices = @transform_3, window_bounds = array<i64: 128, 64>}, {pipeline_mode = #tpu.pipeline_mode<synchronous>, transform_indices = @transform_4, window_bounds = array<i64: 1, 64>}, {pipeline_mode = #tpu.pipeline_mode<synchronous>, transform_indices = @transform_5, window_bounds = array<i64: 16, 64>}]} {
    %c0 = arith.constant 0 : index
    %c0_0 = arith.constant 0 : index
    %0 = vector.load %arg1[%c0, %c0_0] : memref<16x64xf32, #tpu.memory_space<vmem>>, vector<16x64xf32>
    %c0_1 = arith.constant 0 : index
    %c0_2 = arith.constant 0 : index
    %1 = vector.load %arg2[%c0_1, %c0_2] : memref<64x128xf32, #tpu.memory_space<vmem>>, vector<64x128xf32>
    %cst = arith.constant dense<0.000000e+00> : vector<16x128xf32>
    %2 = tpu.matmul %0, %1, %cst {dimension_numbers = #tpu.dot_dimension_numbers<[1], [0], [0], [1], [0, 0, 1, 1], [], []>} : vector<16x64xf32>, vector<64x128xf32>, vector<16x128xf32> -> vector<16x128xf32>
    %c0_3 = arith.constant 0 : index
    %c0_4 = arith.constant 0 : index
    %3 = vector.load %arg3[%c0_3, %c0_4] : memref<1x128xf32, #tpu.memory_space<vmem>>, vector<1x128xf32>
    %4 = vector.broadcast %3 : vector<1x128xf32> to vector<16x128xf32>
    %5 = arith.addf %2, %4 : vector<16x128xf32>
    %cst_5 = arith.constant 0.000000e+00 : f32
    %6 = vector.broadcast %cst_5 : f32 to vector<16x128xf32>
    %7 = arith.maximumf %5, %6 : vector<16x128xf32>
    %c0_6 = arith.constant 0 : index
    %c0_7 = arith.constant 0 : index
    %8 = vector.load %arg4[%c0_6, %c0_7] : memref<128x64xf32, #tpu.memory_space<vmem>>, vector<128x64xf32>
    %cst_8 = arith.constant dense<0.000000e+00> : vector<16x64xf32>
    %9 = tpu.matmul %7, %8, %cst_8 {dimension_numbers = #tpu.dot_dimension_numbers<[1], [0], [0], [1], [0, 0, 1, 1], [], []>} : vector<16x128xf32>, vector<128x64xf32>, vector<16x64xf32> -> vector<16x64xf32>
    %c0_9 = arith.constant 0 : index
    %c0_10 = arith.constant 0 : index
    %10 = vector.load %arg5[%c0_9, %c0_10] : memref<1x64xf32, #tpu.memory_space<vmem>>, vector<1x64xf32>
    %11 = vector.broadcast %10 : vector<1x64xf32> to vector<16x64xf32>
    %12 = arith.addf %9, %11 : vector<16x64xf32>
    %c0_11 = arith.constant 0 : index
    %c0_12 = arith.constant 0 : index
    %13 = vector.load %arg6[%c0_11, %c0_12] : memref<16x64xf32, #tpu.memory_space<vmem>>, vector<16x64xf32>
    tpu.vector_store %arg6[%c0_11, %c0_12], %12 {strides = array<i32>} : memref<16x64xf32, #tpu.memory_space<vmem>>, vector<16x64xf32>,
    return
  }
  func.func @transform_0(%arg0: i32) -> (i32, i32) {
    %c0_i32 = arith.constant 0 : i32
    %c0_i32_0 = arith.constant 0 : i32
    %c0_i32_1 = arith.constant 0 : i32
    return %c0_i32, %c0_i32_0 : i32, i32
  }
  func.func @transform_1(%arg0: i32) -> (i32, i32) {
    %c0_i32 = arith.constant 0 : i32
    %c0_i32_0 = arith.constant 0 : i32
    %c0_i32_1 = arith.constant 0 : i32
    return %c0_i32, %c0_i32_0 : i32, i32
  }
  func.func @transform_2(%arg0: i32) -> (i32, i32) {
    %c0_i32 = arith.constant 0 : i32
    %c0_i32_0 = arith.constant 0 : i32
    %c0_i32_1 = arith.constant 0 : i32
    return %c0_i32, %c0_i32_0 : i32, i32
  }
  func.func @transform_3(%arg0: i32) -> (i32, i32) {
    %c0_i32 = arith.constant 0 : i32
    %c0_i32_0 = arith.constant 0 : i32
    %c0_i32_1 = arith.constant 0 : i32
    return %c0_i32, %c0_i32_0 : i32, i32
  }
  func.func @transform_4(%arg0: i32) -> (i32, i32) {
    %c0_i32 = arith.constant 0 : i32
    %c0_i32_0 = arith.constant 0 : i32
    %c0_i32_1 = arith.constant 0 : i32
    return %c0_i32, %c0_i32_0 : i32, i32
  }
  func.func @transform_5(%arg0: i32) -> (i32, i32) {
    %c0_i32 = arith.constant 0 : i32
    %c0_i32_0 = arith.constant 0 : i32
    %c0_i32_1 = arith.constant 0 : i32
    return %c0_i32, %c0_i32_0 : i32, i32
  }
}

</mosaic_0001>

<bundles_post_ra>
// kernel: tpu_custom_call.1
= control target key start
LH: loop header
LB: loop body
LE: loop exit
PB: predicated region body
PF: predicated region fallthrough
CT: control target
= control target key end

     0   :  { %vm38_vm0 = vcmask 523264   ;;  %s473_s0 = inlined_call_operand.vmem [shape: f32[16,64], index: 0, kind: input, shape index: {}]   ;;  %s474_s1 = inlined_call_operand.vmem [shape: f32[64,128], index: 1, kind: input, shape index: {}]   ;;  %s475_s2 = inlined_call_operand.vmem [shape: f32[1,128], index: 2, kind: input, shape index: {}]   ;;  %s476_s3 = inlined_call_operand.vmem [shape: f32[128,64], index: 3, kind: input, shape index: {}]   ;;  %s477_s4 = inlined_call_operand.vmem [shape: f32[1,64], index: 4, kind: input, shape index: {}]   ;;  %s478_s5 = inlined_call_operand.hbm [shape: f32[16,64], index: 5, kind: output, shape index: {}]  }
   0x1   :  { %v30_v0 = vld [vmem:[%s474_s1 + $0x38] sm:$0xff]  ;;  %v29_v1 = vld [vmem:[%s474_s1 + $0x30] sm:$0xff]  ;;  %v28_v2 = vld [vmem:[%s474_s1 + $0x28] sm:$0xff] }
   0x2   :  { %270 = vmatprep.subr.mxu0 %v30_v0  ;;  %v21_v3 = vld [vmem:[%s473_s0] sm:$0xff]  ;;  %v137_v4 = vld [vmem:[%s476_s3 + $0x78] sm:$0xff]  ;;  %v136_v5 = vld [vmem:[%s476_s3 + $0x70] sm:$0xff] }
   0x3   :  { %271 = vmatpush3.msra.mxu0 %v30_v0  ;;  %286 = vmatprep.mubr.msk.f32.mxu0 %vm38_vm0, %v21_v3  ;;  %v27_v6 = vld [vmem:[%s474_s1 + $0x20] sm:$0xff]  ;;  %v135_v7 = vld [vmem:[%s476_s3 + $0x68] sm:$0xff]  ;;  %v26_v8 = vld [vmem:[%s474_s1 + $0x18] sm:$0xff] }
   0x4   :  { %272 = vmatprep.subr.mxu0 %v29_v1  ;;  %289 = vmatprep.subr.mxu1 %v137_v4  ;;  %v134_v9 = vld [vmem:[%s476_s3 + $0x60] sm:$0xff] }
   0x5   :  { %273 = vmatpush3.msra.mxu0 %v29_v1  ;;  %290 = vmatpush3.msra.mxu1 %v137_v4 }
   0x6   :  { %274 = vmatprep.subr.mxu0 %v28_v2  ;;  %291 = vmatprep.subr.mxu1 %v136_v5 }
   0x7   :  { %275 = vmatpush3.msra.mxu0 %v28_v2  ;;  %292 = vmatpush3.msra.mxu1 %v136_v5 }
   0x8   :  { %276 = vmatprep.subr.mxu0 %v27_v6 }
   0x9   :  { %10 = vsyncpa [#allocation3], 0  ;;  %277 = vmatpush3.msra.mxu0 %v27_v6  ;;  %v25_v10 = vld [vmem:[%s474_s1 + $0x10] sm:$0xff]  ;;  %293 = vmatprep.subr.mxu1 %v135_v7  ;;  %v133_v11 = vld [vmem:[%s476_s3 + $0x58] sm:$0xff] }
   0xa   :  { %278 = vmatprep.subr.mxu0 %v26_v8  ;;  %294 = vmatpush3.msra.mxu1 %v135_v7  ;;  %v24_v12 = vld [vmem:[%s474_s1 + $0x8] sm:$0xff]  ;;  %v132_v13 = vld [vmem:[%s476_s3 + $0x50] sm:$0xff]  ;;  %v23_v14 = vld [vmem:[%s474_s1] sm:$0xff] }
   0xb   :  { %279 = vmatpush3.msra.mxu0 %v26_v8  ;;  %295 = vmatprep.subr.mxu1 %v134_v9  ;;  %v131_v15 = vld [vmem:[%s476_s3 + $0x48] sm:$0xff]  ;;  %v130_v17 = vld [vmem:[%s476_s3 + $0x40] sm:$0xff]  ;;  %v129_v18 = vld [vmem:[%s476_s3 + $0x38] sm:$0xff] }
   0xc   :  { %280 = vmatprep.subr.mxu0 %v25_v10  ;;  %296 = vmatpush3.msra.mxu1 %v134_v9  ;;  %v22_v16 = vld [vmem:[%s473_s0 + $0x8] sm:$0xff]  ;;  %v128_v19 = vld [vmem:[%s476_s3 + $0x30] sm:$0xff]  ;;  %v126_v21 = vld [vmem:[%s476_s3 + $0x20] sm:$0xff] }
   0xd   :  { %281 = vmatpush3.msra.mxu0 %v25_v10  ;;  %297 = vmatprep.subr.mxu1 %v133_v11  ;;  %v127_v20 = vld [vmem:[%s476_s3 + $0x28] sm:$0xff]  ;;  %v125_v22 = vld [vmem:[%s476_s3 + $0x18] sm:$0xff]  ;;  %v124_v23 = vld [vmem:[%s476_s3 + $0x10] sm:$0xff] }
   0xe   :  { %282 = vmatprep.subr.mxu0 %v24_v12  ;;  %298 = vmatpush3.msra.mxu1 %v133_v11  ;;  %v123_v24 = vld [vmem:[%s476_s3 + $0x8] sm:$0xff]  ;;  %v122_v25 = vld [vmem:[%s476_s3] sm:$0xff]  ;;  %s349_s3 = smov [#allocation2]  }
   0xf   :  { %283 = vmatpush3.msra.mxu0 %v24_v12  ;;  %299 = vmatprep.subr.mxu1 %v132_v13  ;;  %v238_v26 = vld [vmem:[%s475_s2] ss:$0 sm:$0xff]  ;;  %s227_s22 = sshll.u32 %s349_s3, 4  ;;  %s228_s22 = int_to_ptr.vmem [resolvable:$true] %s227_s22 }
  0x10   :  { %284 = vmatprep.subr.mxu0 %v23_v14  ;;  %300 = vmatpush3.msra.mxu1 %v132_v13  ;;  %v241_v33 = vld [vmem:[%s477_s4] ss:$0 sm:$0xff]  ;;  %s327_s2 = scalar_lea.vmem %s228_s22, 256  ;;  %p332_p1 = scmp.lt.s32.totalorder %s228_s22, %s228_s22 }
  0x11   :  { %285 = vmatpush3.msra.mxu0 %v23_v14  ;;  %301 = vmatprep.subr.mxu1 %v131_v15  ;;  %p328_p0 = scmp.ne.s32.totalorder %s228_s22, %s327_s2  ;;  %p333_p2 = scmp.lt.s32.totalorder %s327_s2, %s327_s2 }
  0x12   :  { %287 = vmatmul.mubr.msk.f32.vlgmr.msra.gmra.mxu0 %vm38_vm0, %v22_v16  ;;  %302 = vmatpush3.msra.mxu1 %v131_v15 }
  0x13   :  { %303 = vmatprep.subr.mxu1 %v130_v17  ;;  %p334_p3 = por %p333_p2, %p332_p1 }
  0x14   :  { %304 = vmatpush3.msra.mxu1 %v130_v17 }
  0x15   :  { %305 = vmatprep.subr.mxu1 %v129_v18  ;;  %p335_p4 = pnand %p334_p3, %p328_p0 }
  0x16   :  { %306 = vmatpush3.msra.mxu1 %v129_v18 }
  0x17   :  { %307 = vmatprep.subr.mxu1 %v128_v19 }
  0x18   :  { %308 = vmatpush3.msra.mxu1 %v128_v19 }
  0x19   :  { %309 = vmatprep.subr.mxu1 %v127_v20 }
  0x1a   :  { %310 = vmatpush3.msra.mxu1 %v127_v20 }
  0x1b   :  { %311 = vmatprep.subr.mxu1 %v126_v21 }
  0x1c   :  { %312 = vmatpush3.msra.mxu1 %v126_v21 }
  0x1d   :  { %313 = vmatprep.subr.mxu1 %v125_v22 }
  0x1e   :  { %314 = vmatpush3.msra.mxu1 %v125_v22 }
  0x1f   :  { %315 = vmatprep.subr.mxu1 %v124_v23 }
  0x20   :  { %316 = vmatpush3.msra.mxu1 %v124_v23 }
  0x21   :  { %317 = vmatprep.subr.mxu1 %v123_v24 }
  0x22   :  { %318 = vmatpush3.msra.mxu1 %v123_v24 }
  0x23   :  { %319 = vmatprep.subr.mxu1 %v122_v25 }
  0x24   :  { %320 = vmatpush3.msra.mxu1 %v122_v25 }
  0xd2   :  { %v288_v27 = vpop.f32.mrf.mxu0 }
  0xd3   :  { %v117_v28 = vadd.f32 %v288_v27, %v238_v26 }
  0xd4   :  { %v111_v29 = vpop.f32.mrf.mxu0 }
  0xd5   :  { %v112_v30 = vadd.f32 %v238_v26, %v111_v29  ;;  %v121_v32 = vmax.f32 %v117_v28, 0.0 }
  0xd7   :  { %v120_v31 = vmax.f32 %v112_v30, 0.0 }
  0xd9   :  { %321 = vmatprep.mubr.f32.mxu1 %v120_v31 }
  0xda   :  { %322 = vmatmul.mubr.f32.vlgmr.msra.gmra.mxu1 %v121_v32 }
 0x19a   :  { %v323_v34 = vpop.f32.mrf.mxu1 }
 0x19b   :  { %v217_v35 = vadd.f32 %v323_v34, %v241_v33 }
 0x19c   :  { %v211_v36 = vpop.f32.mrf.mxu1 }
 0x19d   :  { %221 = vst.msk [vmem:[#allocation2 + $0x8] sm:$0xff] %vm38_vm0, %v217_v35  ;;  %v212_v37 = vadd.f32 %v241_v33, %v211_v36 }
 0x19f   :  { %220 = vst.msk [vmem:[#allocation2] sm:$0xff] %vm38_vm0, %v212_v37 }
 0x1a0   :  { %338 = shalt.err (!%p335_p4)
}
 0x1a1   :  { %s350_s23 = smov 128   ;;  %s351_s4 = smov 8  }
 0x1a2   :  { %233 = dma.vmem_to_hbm [thread:$0]  %s228_s22, 256, %s478_s5, [#allocation3], %s350_s23, %s350_s23, %s351_s4  }
 0x1a3   :  { %347 = dma.done.wait [#allocation3], 256  }
 0x1a4   :  { %348 = vsyncadd [#allocation3], 4294967040 }
 0x1a5   :  { %237 = vsyncpa [#allocation3], 1 }

</bundles_post_ra>
